<compile_context>
chip_gen: v7x
topology: tpu7x:2x2x1
jax: 0.10.0
libtpu: 0.0.40
codegen_flags: <defaults>
</compile_context>

<pallas_src>
import functools

import jax
import jax.numpy as jnp
from jax import lax
from jax.experimental import pallas as pl
from jax.experimental.pallas import tpu as pltpu

VOCAB = 33
NEG_BIG = -1e30


def _round_up(x, m):
    return ((x + m - 1) // m) * m


# ----------------------------------------------------------------------------
# Kernel 1: get_MSA hot path (softmax / multinomial sample / confidence gather)
#
# Layout: positions on the lane axis, vocab on sublanes.
#   logits_t : [VS=40, R_pad] f32   vocab padded 33->40 with -1e30
#   u        : [msa_n, R_pad] f32   pre-drawn uniforms in (0, 1)
# Outputs:
#   probs_t  : [VS, R_pad]   f32    softmax(probs / T)   (valid rows [:33])
#   pred     : [msa_n, R_pad] int32 sampled token ids
#   conf     : [msa_n, R_pad] f32   prob of the sampled token
# ----------------------------------------------------------------------------
def _msa_kernel(logits_ref, u_ref, probs_ref, pred_ref, conf_ref,
                *, temperature, vocab, msa_n):
    VS, T = logits_ref.shape

    # temperature-scaled softmax over the vocab (sublane) axis
    logits = logits_ref[...] * (1.0 / temperature)
    m = jnp.max(logits, axis=0, keepdims=True)                  # [1, T]
    e = jnp.exp(logits - m)                                     # padded rows -> 0
    denom = jnp.sum(e, axis=0, keepdims=True)                   # [1, T]
    p = e * pl.reciprocal(denom, approx=True)                   # EUP slot
    probs_ref[...] = p

    # inclusive CDF along the vocab axis via a small in-kernel lower-triangular
    # ones matmul (tri built from iotas, no extra input DMA).
    row = lax.broadcasted_iota(jnp.int32, (VS, VS), 0)
    col = lax.broadcasted_iota(jnp.int32, (VS, VS), 1)
    tri = (col <= row).astype(jnp.float32)                      # tri[j, i] = 1 iff i <= j
    cdf = jnp.dot(tri, p, preferred_element_type=jnp.float32)   # [VS, T]

    sub_iota = lax.broadcasted_iota(jnp.int32, (VS, T), 0)

    # msa_n is a small compile-time constant; every store below is a full
    # lane-dense sublane row (no lane-width-1 masked stores).
    for s in range(msa_n):
        u_s = u_ref[pl.ds(s, 1), :]                             # [1, T], u in (0, 1)
        # inverse-CDF sample: first index j with cdf[j] >= u
        pred_s = jnp.sum((cdf < u_s).astype(jnp.int32), axis=0, keepdims=True)
        pred_s = jnp.minimum(pred_s, vocab - 1)
        # gather the sampled token's probability via one-hot sublane reduction
        onehot = (sub_iota == pred_s).astype(jnp.float32)
        conf_s = jnp.sum(p * onehot, axis=0, keepdims=True)
        pred_ref[pl.ds(s, 1), :] = pred_s
        conf_ref[pl.ds(s, 1), :] = conf_s


def get_msa_pallas(probs, attention_mask, title, *, temperature, msa_n, seed,
                   max_tile_r=512):
    """Pallas version of Design_Model.get_MSA.

    torch.multinomial is realized as inverse-CDF sampling against uniforms
    drawn once on the host with jax.random (the TPU-only pltpu.prng_*
    primitives have no interpret/CPU lowering).  pred_ids/confs are produced
    directly in the [msa_n, B, N] layout the caller reshapes to.
    """
    B, N, V = probs.shape
    R = B * N
    VS = _round_up(V, 8)                                  # 33 -> 40 sublanes
    tile_r = min(max_tile_r, _round_up(R, 128))           # lane-axis tile
    r_pad = _round_up(R, tile_r)
    n_tiles = r_pad // tile_r

    logits_t = jnp.full((VS, r_pad), NEG_BIG, jnp.float32)
    logits_t = logits_t.at[:V, :R].set(
        jnp.transpose(probs.reshape(R, V).astype(jnp.float32)))

    # all random draws in one shot; open at zero to avoid the u == 0 bias
    u = jax.random.uniform(jax.random.PRNGKey(seed), (msa_n, r_pad),
                           jnp.float32, minval=1e-7, maxval=1.0)

    kernel = functools.partial(_msa_kernel, temperature=float(temperature),
                               vocab=int(V), msa_n=int(msa_n))

    probs_t, pred, conf = pl.pallas_call(
        kernel,
        grid=(n_tiles,),
        in_specs=[pl.BlockSpec((VS, tile_r), lambda i: (0, i)),
                  pl.BlockSpec((msa_n, tile_r), lambda i: (0, i))],
        out_specs=(pl.BlockSpec((VS, tile_r), lambda i: (0, i)),
                   pl.BlockSpec((msa_n, tile_r), lambda i: (0, i)),
                   pl.BlockSpec((msa_n, tile_r), lambda i: (0, i))),
        out_shape=(jax.ShapeDtypeStruct((VS, r_pad), jnp.float32),
                   jax.ShapeDtypeStruct((msa_n, r_pad), jnp.int32),
                   jax.ShapeDtypeStruct((msa_n, r_pad), jnp.float32)),
        compiler_params=pltpu.CompilerParams(
            dimension_semantics=("parallel",),
            vmem_limit_bytes=32 * 1024 * 1024),
        cost_estimate=pl.CostEstimate(
            flops=int((2 * VS * VS + (6 + 6 * msa_n) * VS) * r_pad),
            transcendentals=int(VS * r_pad),
            bytes_accessed=int(4 * r_pad * (2 * VS + 3 * msa_n))),
    )(logits_t, u)

    probs_sm = jnp.transpose(probs_t[:V, :R]).reshape(B, N, V)
    pred_ids = pred[:, :R].reshape(msa_n, B, N)
    confs = conf[:, :R].reshape(msa_n, B, N)

    # The original get_MSA torch.cat's msa_n identical copies of probs and
    # attention_mask; replication is kept lazy (stored once) since the
    # downstream stand-ins never consume the per-copy replicas.
    msa = {
        "title": title * msa_n,               # sum(titles, [])
        "probs": probs_sm,                    # [B, N, V]
        "pred_ids": pred_ids,                 # [msa_n, B, N]
        "confs": confs,                       # [msa_n, B, N]
        "attention_mask": attention_mask,     # [B, N]
    }
    return msa


# ----------------------------------------------------------------------------
# Kernel 2: fused tuning reduction
#   confs_mean = mean_s confs[s]                      (GNNTuning stand-in)
#   avg_confs  = sum_n(mask * confs_mean) / sum_n(mask)
# Fused into one pallas_call so confs make a single HBM round trip.
# ----------------------------------------------------------------------------
def _tuning_reduce_kernel(mask_ref, confs_ref, mean_ref, avg_ref):
    msa_n = confs_ref.shape[0]
    mean_c = jnp.sum(confs_ref[...], axis=0) * (1.0 / msa_n)    # [B, N]
    mean_ref[...] = mean_c
    m = mask_ref[...]                                           # [B, N]
    num = jnp.sum(m * mean_c, axis=1, keepdims=True)
    den = jnp.sum(m, axis=1, keepdims=True)
    # NOTE: an all-zero mask row yields inf/NaN, matching the torch reference.
    avg_ref[...] = num * pl.reciprocal(den, approx=True)


def tuning_reduce_pallas(attention_mask, confs_msa):
    msa_n, B, N = confs_msa.shape
    mean_c, avg = pl.pallas_call(
        _tuning_reduce_kernel,
        out_shape=(jax.ShapeDtypeStruct((B, N), jnp.float32),
                   jax.ShapeDtypeStruct((B, 1), jnp.float32)),
        in_specs=[pl.BlockSpec(memory_space=pltpu.MemorySpace.VMEM),
                  pl.BlockSpec(memory_space=pltpu.MemorySpace.VMEM)],
        out_specs=(pl.BlockSpec(memory_space=pltpu.MemorySpace.VMEM),
                   pl.BlockSpec(memory_space=pltpu.MemorySpace.VMEM)),
    )(attention_mask.astype(jnp.float32), confs_msa.astype(jnp.float32))
    return mean_c, avg[:, 0]


# ----------------------------------------------------------------------------
# Design_Model.forward (synthetic submodules, real Pallas compute)
# ----------------------------------------------------------------------------
def design_model_forward(batch, *, temperature, msa_n, seed=0):
    # TODO(synk): self.design_model is an external pretrained GNN (MemoPiFold);
    # stand-in passes through deterministic logits/confs matching its interface.
    pretrain_design = {
        "title": batch["title"],
        "probs": batch["design_logits"],            # [B, N, 33]
        "confs": batch["design_confs"],             # [B, N]
        "attention_mask": batch["attention_mask"],  # [B, N]
    }

    # use_LM branch: get_MSA (Pallas) then LM embedding (external).
    pretrain_msa = get_msa_pallas(pretrain_design["probs"],
                                  pretrain_design["attention_mask"],
                                  pretrain_design["title"],
                                  temperature=temperature, msa_n=msa_n, seed=seed)
    B, N = pretrain_design["confs"].shape
    # TODO(synk): self.LM_model (ESM) is an external pretrained language model;
    # stand-in is identity on the MSA fields (already in [msa_n, B, N] layout).
    pretrain_esm_msa = {
        "pred_ids": pretrain_msa["pred_ids"],
        "confs": pretrain_msa["confs"],
        "attention_mask": jnp.broadcast_to(
            pretrain_msa["attention_mask"][None], (msa_n, B, N)),
    }

    # TODO(synk): use_gearnet / use_esmif branches need external Struct/ESMIF
    # models and a tokenizer decode; not representable in-kernel.

    # TODO(synk): self.GNNTuning (MemoTuning) is a separate tunable module;
    # stand-in returns the MSA-averaged confidences with the design mask.
    confs_mean, avg_confs = tuning_reduce_pallas(
        pretrain_design["attention_mask"], pretrain_esm_msa["confs"])

    results = {
        "confs": confs_mean,                                  # [B, N]
        "attention_mask": pretrain_design["attention_mask"],  # [B, N]
        "pretrain_esm_msa": pretrain_esm_msa,
        "avg_confs": avg_confs,                               # [B]
    }
    return results


if __name__ == "__main__":
    key = jax.random.PRNGKey(0)
    B, N, V = 2, 8, VOCAB
    msa_n = 3
    temperature = 1.0

    k1, k2 = jax.random.split(key)
    design_logits = jax.random.normal(k1, (B, N, V), jnp.float32)
    design_confs = jax.nn.sigmoid(jax.random.normal(k2, (B, N), jnp.float32))
    lengths = jnp.array([8, 6], jnp.int32)
    attention_mask = (jnp.arange(N)[None, :] < lengths[:, None]).astype(jnp.float32)

    batch = {
        "title": ["prot_a", "prot_b"],
        "design_logits": design_logits,
        "design_confs": design_confs,
        "attention_mask": attention_mask,
    }

    results = design_model_forward(batch, temperature=temperature,
                                   msa_n=msa_n, seed=0)
    jax.block_until_ready(results["avg_confs"])

    assert results["avg_confs"].shape == (B,)
    assert results["confs"].shape == (B, N)
    assert results["pretrain_esm_msa"]["pred_ids"].shape == (msa_n, B, N)
    assert bool(jnp.all(results["pretrain_esm_msa"]["pred_ids"] >= 0))
    assert bool(jnp.all(results["pretrain_esm_msa"]["pred_ids"] < V))
    assert bool(jnp.all(jnp.isfinite(results["avg_confs"])))
    print("KERNEL_OK")
</pallas_src>

<mosaic_0001>
module attributes {stable_mosaic.version = 11 : i64} {
  func.func @_msa_kernel(%arg0: i32, %arg1: memref<40x128xf32, #tpu.memory_space<vmem>>, %arg2: memref<3x128xf32, #tpu.memory_space<vmem>>, %arg3: memref<40x128xf32, #tpu.memory_space<vmem>>, %arg4: memref<3x128xi32, #tpu.memory_space<vmem>>, %arg5: memref<3x128xf32, #tpu.memory_space<vmem>>) attributes {dimension_semantics = [#tpu.dimension_semantics<parallel>], iteration_bounds = array<i64: 1>, scalar_prefetch = 0 : i64, scratch_operands = 0 : i64, tpu.core_type = #tpu.core_type<tc>, window_params = [{transform_indices = @transform_0, window_bounds = array<i64: 40, 128>}, {transform_indices = @transform_1, window_bounds = array<i64: 3, 128>}, {transform_indices = @transform_2, window_bounds = array<i64: 40, 128>}, {transform_indices = @transform_3, window_bounds = array<i64: 3, 128>}, {transform_indices = @transform_4, window_bounds = array<i64: 3, 128>}]} {
    %c0 = arith.constant 0 : index
    %c0_0 = arith.constant 0 : index
    %0 = vector.load %arg1[%c0, %c0_0] : memref<40x128xf32, #tpu.memory_space<vmem>>, vector<40x128xf32>
    %cst = arith.constant 1.000000e+00 : f32
    %1 = vector.broadcast %cst : f32 to vector<40x128xf32>
    %2 = arith.mulf %0, %1 : vector<40x128xf32>
    %cst_1 = arith.constant dense<0xFF800000> : vector<128xf32>
    %3 = vector.multi_reduction <maximumf>, %2, %cst_1 [0] : vector<40x128xf32> to vector<128xf32>
    %4 = vector.shape_cast %3 : vector<128xf32> to vector<1x128xf32>
    %5 = vector.broadcast %4 : vector<1x128xf32> to vector<40x128xf32>
    %6 = arith.subf %2, %5 : vector<40x128xf32>
    %7 = math.exp %6 : vector<40x128xf32>
    %cst_2 = arith.constant dense<0.000000e+00> : vector<128xf32>
    %8 = vector.multi_reduction <add>, %7, %cst_2 [0] : vector<40x128xf32> to vector<128xf32>
    %9 = vector.shape_cast %8 : vector<128xf32> to vector<1x128xf32>
    %10 = tpu.reciprocal %9 {approx = true} : vector<1x128xf32> -> vector<1x128xf32>
    %11 = vector.broadcast %10 : vector<1x128xf32> to vector<40x128xf32>
    %12 = arith.mulf %7, %11 : vector<40x128xf32>
    %c0_3 = arith.constant 0 : index
    %c0_4 = arith.constant 0 : index
    %13 = vector.load %arg3[%c0_3, %c0_4] : memref<40x128xf32, #tpu.memory_space<vmem>>, vector<40x128xf32>
    tpu.vector_store %arg3[%c0_3, %c0_4], %12 {strides = array<i32>} : memref<40x128xf32, #tpu.memory_space<vmem>>, vector<40x128xf32>,
    %14 = tpu.iota {dimensions = array<i32: 0>} : vector<40x40xi32>
    %15 = tpu.iota {dimensions = array<i32: 1>} : vector<40x40xi32>
    %16 = arith.cmpi sle, %15, %14 : vector<40x40xi32>
    %17 = arith.extui %16 : vector<40x40xi1> to vector<40x40xi32>
    %18 = arith.sitofp %17 : vector<40x40xi32> to vector<40x40xf32>
    %cst_5 = arith.constant dense<0.000000e+00> : vector<40x128xf32>
    %19 = tpu.matmul %18, %12, %cst_5 {dimension_numbers = #tpu.dot_dimension_numbers<[1], [0], [0], [1], [0, 0, 1, 1], [], []>} : vector<40x40xf32>, vector<40x128xf32>, vector<40x128xf32> -> vector<40x128xf32>
    %20 = tpu.iota {dimensions = array<i32: 0>} : vector<40x128xi32>
    %c0_6 = arith.constant 0 : index
    %c0_7 = arith.constant 0 : index
    %21 = vector.load %arg2[%c0_6, %c0_7] : memref<3x128xf32, #tpu.memory_space<vmem>>, vector<1x128xf32>
    %22 = vector.broadcast %21 : vector<1x128xf32> to vector<40x128xf32>
    %23 = arith.cmpf olt, %19, %22 : vector<40x128xf32>
    %24 = arith.extui %23 : vector<40x128xi1> to vector<40x128xi32>
    %cst_8 = arith.constant dense<0> : vector<128xi32>
    %25 = vector.multi_reduction <add>, %24, %cst_8 [0] : vector<40x128xi32> to vector<128xi32>
    %26 = vector.shape_cast %25 : vector<128xi32> to vector<1x128xi32>
    %c32_i32 = arith.constant 32 : i32
    %27 = vector.broadcast %c32_i32 : i32 to vector<1x128xi32>
    %28 = arith.minsi %26, %27 : vector<1x128xi32>
    %29 = vector.broadcast %28 : vector<1x128xi32> to vector<40x128xi32>
    %30 = arith.cmpi eq, %20, %29 : vector<40x128xi32>
    %31 = arith.extui %30 : vector<40x128xi1> to vector<40x128xi32>
    %32 = arith.sitofp %31 : vector<40x128xi32> to vector<40x128xf32>
    %33 = arith.mulf %12, %32 : vector<40x128xf32>
    %cst_9 = arith.constant dense<0.000000e+00> : vector<128xf32>
    %34 = vector.multi_reduction <add>, %33, %cst_9 [0] : vector<40x128xf32> to vector<128xf32>
    %35 = vector.shape_cast %34 : vector<128xf32> to vector<1x128xf32>
    %c0_10 = arith.constant 0 : index
    %c0_11 = arith.constant 0 : index
    %36 = vector.load %arg4[%c0_10, %c0_11] : memref<3x128xi32, #tpu.memory_space<vmem>>, vector<1x128xi32>
    tpu.vector_store %arg4[%c0_10, %c0_11], %28 {strides = array<i32>} : memref<3x128xi32, #tpu.memory_space<vmem>>, vector<1x128xi32>,
    %c0_12 = arith.constant 0 : index
    %c0_13 = arith.constant 0 : index
    %37 = vector.load %arg5[%c0_12, %c0_13] : memref<3x128xf32, #tpu.memory_space<vmem>>, vector<1x128xf32>
    tpu.vector_store %arg5[%c0_12, %c0_13], %35 {strides = array<i32>} : memref<3x128xf32, #tpu.memory_space<vmem>>, vector<1x128xf32>,
    %c1 = arith.constant 1 : index
    %c0_14 = arith.constant 0 : index
    %38 = vector.load %arg2[%c1, %c0_14] : memref<3x128xf32, #tpu.memory_space<vmem>>, vector<1x128xf32>
    %39 = vector.broadcast %38 : vector<1x128xf32> to vector<40x128xf32>
    %40 = arith.cmpf olt, %19, %39 : vector<40x128xf32>
    %41 = arith.extui %40 : vector<40x128xi1> to vector<40x128xi32>
    %cst_15 = arith.constant dense<0> : vector<128xi32>
    %42 = vector.multi_reduction <add>, %41, %cst_15 [0] : vector<40x128xi32> to vector<128xi32>
    %43 = vector.shape_cast %42 : vector<128xi32> to vector<1x128xi32>
    %c32_i32_16 = arith.constant 32 : i32
    %44 = vector.broadcast %c32_i32_16 : i32 to vector<1x128xi32>
    %45 = arith.minsi %43, %44 : vector<1x128xi32>
    %46 = vector.broadcast %45 : vector<1x128xi32> to vector<40x128xi32>
    %47 = arith.cmpi eq, %20, %46 : vector<40x128xi32>
    %48 = arith.extui %47 : vector<40x128xi1> to vector<40x128xi32>
    %49 = arith.sitofp %48 : vector<40x128xi32> to vector<40x128xf32>
    %50 = arith.mulf %12, %49 : vector<40x128xf32>
    %cst_17 = arith.constant dense<0.000000e+00> : vector<128xf32>
    %51 = vector.multi_reduction <add>, %50, %cst_17 [0] : vector<40x128xf32> to vector<128xf32>
    %52 = vector.shape_cast %51 : vector<128xf32> to vector<1x128xf32>
    %c1_18 = arith.constant 1 : index
    %c0_19 = arith.constant 0 : index
    %53 = vector.load %arg4[%c1_18, %c0_19] : memref<3x128xi32, #tpu.memory_space<vmem>>, vector<1x128xi32>
    tpu.vector_store %arg4[%c1_18, %c0_19], %45 {strides = array<i32>} : memref<3x128xi32, #tpu.memory_space<vmem>>, vector<1x128xi32>,
    %c1_20 = arith.constant 1 : index
    %c0_21 = arith.constant 0 : index
    %54 = vector.load %arg5[%c1_20, %c0_21] : memref<3x128xf32, #tpu.memory_space<vmem>>, vector<1x128xf32>
    tpu.vector_store %arg5[%c1_20, %c0_21], %52 {strides = array<i32>} : memref<3x128xf32, #tpu.memory_space<vmem>>, vector<1x128xf32>,
    %c2 = arith.constant 2 : index
    %c0_22 = arith.constant 0 : index
    %55 = vector.load %arg2[%c2, %c0_22] : memref<3x128xf32, #tpu.memory_space<vmem>>, vector<1x128xf32>
    %56 = vector.broadcast %55 : vector<1x128xf32> to vector<40x128xf32>
    %57 = arith.cmpf olt, %19, %56 : vector<40x128xf32>
    %58 = arith.extui %57 : vector<40x128xi1> to vector<40x128xi32>
    %cst_23 = arith.constant dense<0> : vector<128xi32>
    %59 = vector.multi_reduction <add>, %58, %cst_23 [0] : vector<40x128xi32> to vector<128xi32>
    %60 = vector.shape_cast %59 : vector<128xi32> to vector<1x128xi32>
    %c32_i32_24 = arith.constant 32 : i32
    %61 = vector.broadcast %c32_i32_24 : i32 to vector<1x128xi32>
    %62 = arith.minsi %60, %61 : vector<1x128xi32>
    %63 = vector.broadcast %62 : vector<1x128xi32> to vector<40x128xi32>
    %64 = arith.cmpi eq, %20, %63 : vector<40x128xi32>
    %65 = arith.extui %64 : vector<40x128xi1> to vector<40x128xi32>
    %66 = arith.sitofp %65 : vector<40x128xi32> to vector<40x128xf32>
    %67 = arith.mulf %12, %66 : vector<40x128xf32>
    %cst_25 = arith.constant dense<0.000000e+00> : vector<128xf32>
    %68 = vector.multi_reduction <add>, %67, %cst_25 [0] : vector<40x128xf32> to vector<128xf32>
    %69 = vector.shape_cast %68 : vector<128xf32> to vector<1x128xf32>
    %c2_26 = arith.constant 2 : index
    %c0_27 = arith.constant 0 : index
    %70 = vector.load %arg4[%c2_26, %c0_27] : memref<3x128xi32, #tpu.memory_space<vmem>>, vector<1x128xi32>
    tpu.vector_store %arg4[%c2_26, %c0_27], %62 {strides = array<i32>} : memref<3x128xi32, #tpu.memory_space<vmem>>, vector<1x128xi32>,
    %c2_28 = arith.constant 2 : index
    %c0_29 = arith.constant 0 : index
    %71 = vector.load %arg5[%c2_28, %c0_29] : memref<3x128xf32, #tpu.memory_space<vmem>>, vector<1x128xf32>
    tpu.vector_store %arg5[%c2_28, %c0_29], %69 {strides = array<i32>} : memref<3x128xf32, #tpu.memory_space<vmem>>, vector<1x128xf32>,
    return
  }
  func.func @transform_0(%arg0: i32) -> (i32, i32) {
    %c0_i32 = arith.constant 0 : i32
    %c0_i32_0 = arith.constant 0 : i32
    return %c0_i32, %arg0 : i32, i32
  }
  func.func @transform_1(%arg0: i32) -> (i32, i32) {
    %c0_i32 = arith.constant 0 : i32
    %c0_i32_0 = arith.constant 0 : i32
    return %c0_i32, %arg0 : i32, i32
  }
  func.func @transform_2(%arg0: i32) -> (i32, i32) {
    %c0_i32 = arith.constant 0 : i32
    %c0_i32_0 = arith.constant 0 : i32
    return %c0_i32, %arg0 : i32, i32
  }
  func.func @transform_3(%arg0: i32) -> (i32, i32) {
    %c0_i32 = arith.constant 0 : i32
    %c0_i32_0 = arith.constant 0 : i32
    return %c0_i32, %arg0 : i32, i32
  }
  func.func @transform_4(%arg0: i32) -> (i32, i32) {
    %c0_i32 = arith.constant 0 : i32
    %c0_i32_0 = arith.constant 0 : i32
    return %c0_i32, %arg0 : i32, i32
  }
}

</mosaic_0001>

<bundles_post_ra>
// kernel: tpu_custom_call.1
= control target key start
LH: loop header
LB: loop body
LE: loop exit
PB: predicated region body
PF: predicated region fallthrough
CT: control target
= control target key end

     0   :  { %10 = vsyncpa [#allocation3], 0  ;;  %s896_s0 = inlined_call_operand.hbm [shape: f32[40,128], index: 0, kind: input, shape index: {}]   ;;  %s897_s1 = inlined_call_operand.hbm [shape: f32[3,128], index: 1, kind: input, shape index: {}]   ;;  %s898_s2 = inlined_call_operand.hbm [shape: f32[40,128], index: 2, kind: output, shape index: {0}]   ;;  %s899_s3 = inlined_call_operand.hbm [shape: s32[3,128], index: 3, kind: output, shape index: {1}]   ;;  %s900_s4 = inlined_call_operand.hbm [shape: f32[3,128], index: 4, kind: output, shape index: {2}]  }
   0x1   :  { %11 = vsyncpa [#allocation6], 0 }
   0x2   :  { %12 = vsyncpa [#allocation4], 0 }
   0x3   :  { %13 = vsyncpa [#allocation9], 0  ;;  %s660_s15 = smov [#allocation2]   ;;  %s542_s19 = scalar_lea.hbm %s896_s0, 640 }
   0x4   :  { %s19_s16 = sshll.u32 %s660_s15, 4  ;;  %p543_p0 = scmp.ne.s32.totalorder %s896_s0, %s542_s19  ;;  %s20_s16 = int_to_ptr.vmem [resolvable:$true] %s19_s16 }
   0x5   :  { %p546_p1 = scmp.lt.u32.totalorder %s542_s19, %s896_s0 }
   0x7   :  { %p548_p2 = pnand %p546_p1, %p543_p0 }
   0x9   :  { %551 = shalt.err (!%p548_p2)
}
   0xa   :  { %s552_s24 = scalar_lea.vmem %s20_s16, 640  ;;  %p557_p4 = scmp.lt.s32.totalorder %s20_s16, %s20_s16 }
   0xb   :  { %p553_p3 = scmp.ne.s32.totalorder %s20_s16, %s552_s24  ;;  %p558_p5 = scmp.lt.s32.totalorder %s552_s24, %s552_s24 }
   0xd   :  { %p559_p6 = por %p558_p5, %p557_p4 }
   0xf   :  { %p560_p7 = pnand %p559_p6, %p553_p3 }
  0x11   :  { %563 = shalt.err (!%p560_p7)
}
  0x12   :  { %s661_s25 = smov 128   ;;  %s662_s26 = smov 8  }
  0x13   :  { %25 = dma.hbm_to_vmem [thread:$0]  %s896_s0, 640, %s20_s16, [#allocation3], %s661_s25, %s661_s25, %s662_s26  }
  0x14   :  { %s663_s29 = smov [#allocation5]   ;;  %s564_s7 = scalar_lea.hbm %s897_s1, 64 }
  0x15   :  { %s32_s30 = sshll.u32 %s663_s29, 4  ;;  %p565_p8 = scmp.ne.s32.totalorder %s897_s1, %s564_s7  ;;  %s33_s30 = int_to_ptr.vmem [resolvable:$true] %s32_s30 }
  0x16   :  { %p568_p9 = scmp.lt.u32.totalorder %s564_s7, %s897_s1 }
  0x18   :  { %p570_p10 = pnand %p568_p9, %p565_p8 }
  0x1a   :  { %573 = shalt.err (!%p570_p10)
}
  0x1b   :  { %s574_s12 = scalar_lea.vmem %s33_s30, 64  ;;  %p579_p12 = scmp.lt.s32.totalorder %s33_s30, %s33_s30 }
  0x1c   :  { %p575_p11 = scmp.ne.s32.totalorder %s33_s30, %s574_s12  ;;  %p580_p13 = scmp.lt.s32.totalorder %s574_s12, %s574_s12 }
  0x1e   :  { %p581_p0 = por %p580_p13, %p579_p12 }
  0x20   :  { %p582_p1 = pnand %p581_p0, %p575_p11 }
  0x22   :  { %585 = shalt.err (!%p582_p1)
}
  0x23   :  { %35 = dma.hbm_to_vmem [thread:$0]  %s897_s1, 64, %s33_s30, [#allocation6]  }
  0x24   :  { %652 = dma.done.wait [#allocation3], 640  }
  0x25   :  { %653 = vsyncadd [#allocation3], 4294966656 }
  0x26   :  { %654 = dma.done.wait [#allocation6], 64  }
  0x27   :  { %655 = vsyncadd [#allocation6], 4294967232  ;;  %v664_v0 = vmov 0.0|0.0   ;;  %vm665_vm0 = vmmov 0   ;;  %v666_v1 = vmov 0.0   ;;  %v42_v2 = vld [vmem:[#allocation2] sm:$0xff]  ;;  %v93_v42 = vlaneseq }
  0x28   :  { %507 = vmatprep.subr.bf16.mxu0 %v664_v0  ;;  %513 = vmatprep.subr.bf16.mxu1 %v664_v0  ;;  %v44_v3 = vld [vmem:[#allocation2 + $0x10] sm:$0xff]  ;;  %v43_v4 = vld [vmem:[#allocation2 + $0x8] sm:$0xff]  ;;  %v45_v5 = vld [vmem:[#allocation2 + $0x18] sm:$0xff]  ;;  %vm116_vm3 = vcmask 326656   ;;  %s667_s1 = smov [#allocation7]  }
  0x29   :  { %492 = vmatprep.mubr.msk.f32.mxu0 %vm665_vm0, %v666_v1  ;;  %501 = vmatprep.mubr.msk.f32.mxu1 %vm665_vm0, %v666_v1  ;;  %v46_v6 = vld [vmem:[#allocation2 + $0x20] sm:$0xff]  ;;  %v49_v8 = vmax.f32 %v44_v3, %v45_v5  ;;  %v729_v44 = vshrl.u32 %v93_v42, 7  ;;  %v100_v51 = vand.u32 127, %v93_v42  ;;  %s404_s14 = sshll.u32 %s667_s1, 4  ;;  %s405_s14 = int_to_ptr.vmem [resolvable:$true] %s404_s14 }
  0x2a   :  { %v47_v7 = vmax.f32 %v42_v2, %v46_v6  ;;  %s586_s15 = scalar_lea.vmem %s405_s14, 640  ;;  %p591_p3 = scmp.lt.s32.totalorder %s405_s14, %s405_s14 }
  0x2b   :  { %v749_v52 = vadd.s32 24, %v729_v44  ;;  %vm101_vm1 = vcmp.le.s32.totalorder %v100_v51, %v729_v44  ;;  %v758_v54 = vadd.s32 8, %v729_v44  ;;  %v761_v55 = vadd.s32 32, %v729_v44  ;;  %p587_p2 = scmp.ne.s32.totalorder %s405_s14, %s586_s15  ;;  %p592_p4 = scmp.lt.s32.totalorder %s586_s15, %s586_s15 }
  0x2c   :  { %v48_v9 = vmax.f32 %v47_v7, %v43_v4  ;;  %v444_v56 = vsel %vm101_vm1, 1.0, %v666_v1  ;;  %v770_v58 = vadd.s32 16, %v729_v44 }
  0x2d   :  { %vm104_vm2 = vcmp.le.s32.totalorder %v100_v51, %v749_v52  ;;  %vm102_vm4 = vcmp.le.s32.totalorder %v100_v51, %v758_v54  ;;  %vm105_vm5 = vcmp.le.s32.totalorder %v100_v51, %v761_v55  ;;  %p593_p5 = por %p592_p4, %p591_p3 }
  0x2e   :  { %v50_v10 = vmax.f32 %v48_v9, %v49_v8  ;;  %v447_v57 = vsel %vm104_vm2, 1.0, %v666_v1  ;;  %v445_v59 = vsel %vm102_vm4, 1.0, %v666_v1  ;;  %v448_v60 = vsel %vm105_vm5, 1.0, %v666_v1 }
  0x2f   :  { %vm103_vm6 = vcmp.le.s32.totalorder %v100_v51, %v770_v58  ;;  %p594_p6 = pnand %p593_p5, %p587_p2 }
  0x30   :  { %v51_v11 = vrot.slane %v50_v10, 4  ;;  %v446_v61 = vsel %vm103_vm6, 1.0, %v666_v1 }
  0x32   :  { %v52_v12 = vmax.f32 %v50_v10, %v51_v11 }
  0x34   :  { %v53_v13 = vrot.slane %v52_v12, 2 }
  0x36   :  { %v54_v14 = vmax.f32 %v52_v12, %v53_v13 }
  0x38   :  { %v55_v15 = vrot.slane %v54_v14, 1 }
  0x3a   :  { %v56_v16 = vmax.f32 %v54_v14, %v55_v15 }
  0x3c   :  { %v57_v17 = vsub.f32 %v42_v2, %v56_v16  ;;  %v58_v18 = vsub.f32 %v43_v4, %v56_v16  ;;  %v59_v19 = vsub.f32 %v44_v3, %v56_v16  ;;  %v60_v20 = vsub.f32 %v45_v5, %v56_v16 }
  0x3d   :  { %v61_v21 = vsub.f32 %v46_v6, %v56_v16 }
  0x3e   :  { %v62_v22 = vmul.f32 1.442695, %v57_v17  ;;  %v64_v23 = vmul.f32 1.442695, %v58_v18  ;;  %v66_v24 = vmul.f32 1.442695, %v59_v19 }
  0x3f   :  { %v68_v25 = vmul.f32 1.442695, %v60_v20  ;;  %v70_v26 = vmul.f32 1.442695, %v61_v21 }
  0x40   :  { %530 = vpow2.f32 %v62_v22 }
  0x41   :  { %532 = vpow2.f32 %v64_v23 }
  0x42   :  { %534 = vpow2.f32 %v66_v24 }
  0x43   :  { %536 = vpow2.f32 %v68_v25 }
  0x44   :  { %538 = vpow2.f32 %v70_v26 }
  0x4a   :  { %v531_v27 = vpop.eup %530 }
  0x4b   :  { %v533_v28 = vpop.eup %532 }
  0x4c   :  { %v535_v29 = vpop.eup %534  ;;  %v72_v30 = vadd.f32 %v533_v28, %v531_v27 }
  0x4d   :  { %v537_v31 = vpop.eup %536 }
  0x4e   :  { %v73_v32 = vadd.f32 %v535_v29, %v72_v30  ;;  %v539_v33 = vpop.eup %538 }
  0x50   :  { %v74_v34 = vadd.f32 %v537_v31, %v73_v32 }
  0x52   :  { %v75_v35 = vadd.f32 %v539_v33, %v74_v34 }
  0x54   :  { %v76_v36 = vrot.slane %v75_v35, 4 }
  0x56   :  { %v77_v37 = vadd.f32 %v76_v36, %v75_v35 }
  0x58   :  { %v78_v38 = vrot.slane %v77_v37, 2 }
  0x5a   :  { %v79_v39 = vadd.f32 %v78_v38, %v77_v37 }
  0x5c   :  { %v80_v40 = vrot.slane %v79_v39, 1 }
  0x5e   :  { %v81_v41 = vadd.f32 %v80_v40, %v79_v39 }
  0x60   :  { %540 = vrcp.f32 %v81_v41 }
  0x6a   :  { %v541_v43 = vpop.eup %540 }
  0x6b   :  { %v731_v45 = vmul.f32 %v541_v43, %v531_v27  ;;  %v733_v46 = vmul.f32 %v541_v43, %v533_v28  ;;  %v735_v47 = vmul.f32 %v541_v43, %v535_v29  ;;  %v737_v48 = vmul.f32 %v541_v43, %v537_v31 }
  0x6c   :  { %v739_v49 = vmul.f32 %v541_v43, %v539_v33 }
  0x6d   :  { %v508_v50 = vpack.c.bf16 %v733_v46, %v731_v45  ;;  %88 = vst [vmem:[#allocation7] sm:$0xff] %v731_v45  ;;  %89 = vst [vmem:[#allocation7 + $0x8] sm:$0xff] %v733_v46  ;;  %v511_v53 = vpack.c.bf16 %v737_v48, %v735_v47 }
  0x6e   :  { %90 = vst [vmem:[#allocation7 + $0x10] sm:$0xff] %v735_v47  ;;  %91 = vst [vmem:[#allocation7 + $0x18] sm:$0xff] %v737_v48 }
  0x6f   :  { %92 = vst [vmem:[#allocation7 + $0x20] sm:$0xff] %v739_v49  ;;  %509 = vmatpush3.bf16.msra.mxu0 %v508_v50  ;;  %516 = vmatpush3.bf16.msra.mxu1 %v508_v50 }
  0x70   :  { %510 = vmatprep.subr.bf16.mxu0 %v664_v0  ;;  %514 = vmatprep.subr.bf16.mxu1 %v664_v0 }
  0x73   :  { %512 = vmatpush3.bf16.msra.mxu0 %v511_v53  ;;  %517 = vmatpush3.bf16.msra.mxu1 %v511_v53 }
  0x74   :  { %490 = vmatprep.subr.mxu0 %v666_v1  ;;  %515 = vmatprep.subr.mxu1 %v666_v1 }
  0x77   :  { %491 = vmatpush3.msra.mxu0 %v739_v49  ;;  %518 = vmatpush3.msra.mxu1 %v739_v49 }
  0x78   :  { %493 = vmatmul.mubr.msk.f32.vlgmr.msra.gmra.mrb[0].mxu0 %vm116_vm3, %v444_v56  ;;  %502 = vmatmul.mubr.msk.f32.vlgmr.msra.gmra.mrb[0].mxu1 %vm116_vm3, %v447_v57 }
  0x79   :  { %495 = vmatprep.mubr.msk.f32.mxu0 %vm665_vm0, %v666_v1  ;;  %504 = vmatprep.mubr.msk.f32.mxu1 %vm665_vm0, %v666_v1 }
  0x7c   :  { %496 = vmatmul.mubr.msk.f32.gmra.mrb[2].mxu0 %vm116_vm3, %v445_v59  ;;  %505 = vmatmul.mubr.msk.f32.gmra.mrb[2].mxu1 %vm116_vm3, %v448_v60 }
  0x7d   :  { %498 = vmatprep.mubr.msk.f32.mxu0 %vm665_vm0, %v666_v1 }
  0x80   :  { %499 = vmatmul.mubr.msk.f32.gmra.mrb[4].mxu0 %vm116_vm3, %v446_v61 }
  0x81   :  { %597 = shalt.err (!%p594_p6)
}
  0x82   :  { %s598_s18 = scalar_lea.hbm %s898_s2, 640 }
  0x83   :  { %p599_p7 = scmp.ne.s32.totalorder %s898_s2, %s598_s18  ;;  %p602_p8 = scmp.lt.u32.totalorder %s598_s18, %s898_s2 }
  0x85   :  { %p604_p9 = pnand %p602_p8, %p599_p7 }
  0x87   :  { %607 = shalt.err (!%p604_p9)
}
  0x88   :  { %410 = dma.vmem_to_hbm [thread:$0]  %s405_s14, 640, %s898_s2, [#allocation4], %s661_s25, %s661_s25, %s662_s26   ;;  %v454_v62 = vld [vmem:[#allocation5] ss:$0 sm:$0xff]  ;;  %v460_v63 = vld [vmem:[#allocation5 + $0x1] ss:$0 sm:$0xff] }
  0x89   :  { %v466_v0 = vld [vmem:[#allocation5 + $0x2] ss:$0 sm:$0xff]  ;;  %v668_v6 = vmov 0   ;;  %s669_s2 = smov [#allocation8]  }
  0x8a   :  { %s417_s25 = sshll.u32 %s669_s2, 4  ;;  %s418_s25 = int_to_ptr.vmem [resolvable:$true] %s417_s25 }
  0x8b   :  { %s608_s26 = scalar_lea.vmem %s418_s25, 64  ;;  %p613_p11 = scmp.lt.s32.totalorder %s418_s25, %s418_s25 }
  0x8c   :  { %p609_p10 = scmp.ne.s32.totalorder %s418_s25, %s608_s26  ;;  %p614_p12 = scmp.lt.s32.totalorder %s608_s26, %s608_s26 }
  0x8e   :  { %p615_p13 = por %p614_p12, %p613_p11 }
  0x90   :  { %p616_p0 = pnand %p615_p13, %p609_p10 }
 0x14b   :  { %v198_v2 = vpop.f32.mrb[0].mxu0  ;;  %v213_v3 = vpop.f32.mrb[0].mxu1 }
 0x14c   :  { %vm227_vm7 = vcmp.lt.f32.partialorder %v198_v2, %v454_v62  ;;  %vm286_vm8 = vcmp.lt.f32.partialorder %v198_v2, %v460_v63  ;;  %v494_v4 = vpop.f32.mrb[1].mxu0  ;;  %v503_v5 = vpop.f32.mrb[1].mxu1  ;;  %vm345_vm9 = vcmp.lt.f32.partialorder %v198_v2, %v466_v0  ;;  %vm230_vm10 = vcmp.lt.f32.partialorder %v213_v3, %v454_v62 }
 0x14d   :  { %vm289_vm11 = vcmp.lt.f32.partialorder %v213_v3, %v460_v63  ;;  %v232_v7 = vsel %vm227_vm7, 1, %v668_v6  ;;  %v291_v8 = vsel %vm286_vm8, 1, %v668_v6  ;;  %v350_v11 = vsel %vm345_vm9, 1, %v668_v6 }
 0x14e   :  { %v235_v14 = vsel %vm230_vm10, 1, %v668_v6  ;;  %v294_v15 = vsel %vm289_vm11, 1, %v668_v6  ;;  %vm348_vm15 = vcmp.lt.f32.partialorder %v213_v3, %v466_v0 }
 0x14f   :  { %v203_v9 = vpop.f32.mrb[2].mxu0  ;;  %v218_v10 = vpop.f32.mrb[2].mxu1  ;;  %v353_v33 = vsel %vm348_vm15, 1, %v668_v6 }
 0x150   :  { %vm228_vm12 = vcmp.lt.f32.partialorder %v203_v9, %v454_v62  ;;  %vm287_vm13 = vcmp.lt.f32.partialorder %v203_v9, %v460_v63  ;;  %vm231_vm14 = vcmp.lt.f32.partialorder %v218_v10, %v454_v62  ;;  %v497_v12 = vpop.f32.mrb[3].mxu0  ;;  %v506_v13 = vpop.f32.mrb[3].mxu1  ;;  %vm346_vm0 = vcmp.lt.f32.partialorder %v203_v9, %v466_v0 }
 0x151   :  { %v236_v16 = vsel %vm231_vm14, 1, %v668_v6  ;;  %vm290_vm1 = vcmp.lt.f32.partialorder %v218_v10, %v460_v63  ;;  %vm349_vm2 = vcmp.lt.f32.partialorder %v218_v10, %v466_v0  ;;  %v233_v18 = vsel %vm228_vm12, 1, %v668_v6 }
 0x152   :  { %v237_v17 = vadd.s32 %v236_v16, %v232_v7  ;;  %v292_v19 = vsel %vm287_vm13, 1, %v668_v6  ;;  %v295_v20 = vsel %vm290_vm1, 1, %v668_v6  ;;  %v354_v21 = vsel %vm349_vm2, 1, %v668_v6 }
 0x153   :  { %v208_v22 = vpop.f32.mrb[4].mxu0  ;;  %v296_v24 = vadd.s32 %v295_v20, %v291_v8  ;;  %v355_v25 = vadd.s32 %v354_v21, %v350_v11  ;;  %v351_v27 = vsel %vm346_vm0, 1, %v668_v6 }
 0x154   :  { %v238_v23 = vadd.s32 %v237_v17, %v233_v18  ;;  %vm229_vm3 = vcmp.lt.f32.partialorder %v208_v22, %v454_v62  ;;  %v500_v26 = vpop.f32.mrb[5].mxu0  ;;  %vm288_vm4 = vcmp.lt.f32.partialorder %v208_v22, %v460_v63  ;;  %vm347_vm5 = vcmp.lt.f32.partialorder %v208_v22, %v466_v0 }
 0x155   :  { %v234_v28 = vsel %vm229_vm3, 1, %v668_v6  ;;  %v297_v29 = vadd.s32 %v296_v24, %v292_v19  ;;  %v356_v30 = vadd.s32 %v355_v25, %v351_v27  ;;  %v293_v32 = vsel %vm288_vm4, 1, %v668_v6 }
 0x156   :  { %v239_v31 = vadd.s32 %v235_v14, %v234_v28  ;;  %v298_v34 = vadd.s32 %v294_v15, %v293_v32  ;;  %v352_v35 = vsel %vm347_vm5, 1, %v668_v6 }
 0x157   :  { %v357_v37 = vadd.s32 %v353_v33, %v352_v35 }
 0x158   :  { %v240_v36 = vadd.s32 %v239_v31, %v238_v23  ;;  %v299_v38 = vadd.s32 %v298_v34, %v297_v29 }
 0x159   :  { %v358_v40 = vadd.s32 %v357_v37, %v356_v30 }
 0x15a   :  { %v241_v39 = vrot.slane %v240_v36, 4  ;;  %v300_v41 = vrot.slane %v299_v38, 4 }
 0x15b   :  { %v359_v43 = vrot.slane %v358_v40, 4 }
 0x15c   :  { %v242_v42 = vadd.s32 %v241_v39, %v240_v36  ;;  %v301_v50 = vadd.s32 %v300_v41, %v299_v38 }
 0x15d   :  { %v360_v53 = vadd.s32 %v359_v43, %v358_v40 }
 0x15e   :  { %v243_v51 = vrot.slane %v242_v42, 2  ;;  %v302_v56 = vrot.slane %v301_v50, 2 }
 0x15f   :  { %v361_v59 = vrot.slane %v360_v53, 2 }
 0x160   :  { %v244_v57 = vadd.s32 %v243_v51, %v242_v42  ;;  %v303_v60 = vadd.s32 %v302_v56, %v301_v50 }
 0x161   :  { %v362_v62 = vadd.s32 %v361_v59, %v360_v53 }
 0x162   :  { %v245_v61 = vrot.slane %v244_v57, 1  ;;  %v304_v63 = vrot.slane %v303_v60, 1 }
 0x163   :  { %v363_v2 = vrot.slane %v362_v62, 1 }
 0x164   :  { %v246_v0 = vadd.s32 %v245_v61, %v244_v57  ;;  %v305_v3 = vadd.s32 %v304_v63, %v303_v60 }
 0x165   :  { %v364_v4 = vadd.s32 %v363_v2, %v362_v62 }
 0x166   :  { %vm247_vm6 = vcmp.lt.s32.totalorder %v246_v0, 32  ;;  %vm306_vm7 = vcmp.lt.s32.totalorder %v305_v3, 32 }
 0x167   :  { %v248_v5 = vsel %vm247_vm6, %v246_v0, 32  ;;  %vm365_vm8 = vcmp.lt.s32.totalorder %v364_v4, 32  ;;  %v307_v6 = vsel %vm306_vm7, %v305_v3, 32 }
 0x168   :  { %vm249_vm9 = vcmp.eq.s32.totalorder %v729_v44, %v248_v5  ;;  %vm250_vm10 = vcmp.eq.s32.totalorder %v758_v54, %v248_v5  ;;  %279 = vst [vmem:[#allocation8] sm:$0x1] %v248_v5  ;;  %v807_v7 = vsel %vm365_vm8, %v364_v4, 32  ;;  %vm251_vm11 = vcmp.eq.s32.totalorder %v770_v58, %v248_v5  ;;  %338 = vst [vmem:[#allocation8 + $0x1] sm:$0x1] %v307_v6 }
 0x169   :  { %v455_v8 = vsel %vm249_vm9, 1.0, %v666_v1  ;;  %vm308_vm12 = vcmp.eq.s32.totalorder %v729_v44, %v307_v6  ;;  %vm309_vm13 = vcmp.eq.s32.totalorder %v758_v54, %v307_v6  ;;  %397 = vst [vmem:[#allocation8 + $0x2] sm:$0x1] %v807_v7  ;;  %v456_v9 = vsel %vm250_vm10, 1.0, %v666_v1 }
 0x16a   :  { %vm310_vm14 = vcmp.eq.s32.totalorder %v770_v58, %v307_v6  ;;  %vm367_vm15 = vcmp.eq.s32.totalorder %v729_v44, %v807_v7 }
 0x16b   :  { %619 = shalt.err (!%p616_p0)
}
 0x16c   :  { %s620_s29 = scalar_lea.hbm %s899_s3, 64 }
 0x16d   :  { %p621_p1 = scmp.ne.s32.totalorder %s899_s3, %s620_s29  ;;  %p624_p2 = scmp.lt.u32.totalorder %s620_s29, %s899_s3 }
 0x16f   :  { %p626_p3 = pnand %p624_p2, %p621_p1 }
 0x171   :  { %629 = shalt.err (!%p626_p3)
}
 0x172   :  { %420 = dma.vmem_to_hbm [thread:$0]  %s418_s25, 64, %s899_s3, [#allocation9]   ;;  %v461_v10 = vsel %vm308_vm12, 1.0, %v666_v1  ;;  %vm368_vm0 = vcmp.eq.s32.totalorder %v758_v54, %v807_v7  ;;  %vm252_vm1 = vcmp.eq.s32.totalorder %v749_v52, %v248_v5  ;;  %vm253_vm2 = vcmp.eq.s32.totalorder %v761_v55, %v248_v5 }
 0x173   :  { %v462_v11 = vsel %vm309_vm13, 1.0, %v666_v1  ;;  %vm369_vm3 = vcmp.eq.s32.totalorder %v770_v58, %v807_v7  ;;  %v457_v12 = vsel %vm251_vm11, 1.0, %v666_v1  ;;  %v264_v13 = vmul.f32 %v455_v8, %v731_v45  ;;  %s670_s3 = smov [#allocation10]  }
 0x174   :  { %v467_v14 = vsel %vm367_vm15, 1.0, %v666_v1  ;;  %v458_v15 = vsel %vm252_vm1, 1.0, %v666_v1  ;;  %v459_v16 = vsel %vm253_vm2, 1.0, %v666_v1  ;;  %v265_v54 = vmul.f32 %v456_v9, %v733_v46  ;;  %s427_s10 = sshll.u32 %s670_s3, 4  ;;  %s428_s10 = int_to_ptr.vmem [resolvable:$true] %s427_s10 }
 0x175   :  { %v468_v17 = vsel %vm368_vm0, 1.0, %v666_v1  ;;  %vm311_vm4 = vcmp.eq.s32.totalorder %v749_v52, %v307_v6  ;;  %v463_v18 = vsel %vm310_vm14, 1.0, %v666_v1  ;;  %v323_v19 = vmul.f32 %v461_v10, %v731_v45  ;;  %s630_s11 = scalar_lea.vmem %s428_s10, 64  ;;  %p635_p5 = scmp.lt.s32.totalorder %s428_s10, %s428_s10 }
 0x176   :  { %v266_v20 = vmul.f32 %v457_v12, %v735_v47  ;;  %v269_v44 = vadd.f32 %v265_v54, %v264_v13  ;;  %vm312_vm5 = vcmp.eq.s32.totalorder %v761_v55, %v307_v6  ;;  %v324_v21 = vmul.f32 %v462_v11, %v733_v46  ;;  %p631_p4 = scmp.ne.s32.totalorder %s428_s10, %s630_s11  ;;  %p636_p6 = scmp.lt.s32.totalorder %s630_s11, %s630_s11 }
 0x177   :  { %v267_v22 = vmul.f32 %v458_v15, %v737_v48  ;;  %v268_v23 = vmul.f32 %v459_v16, %v739_v49  ;;  %v464_v24 = vsel %vm311_vm4, 1.0, %v666_v1  ;;  %vm370_vm6 = vcmp.eq.s32.totalorder %v749_v52, %v807_v7 }
 0x178   :  { %v270_v25 = vadd.f32 %v269_v44, %v266_v20  ;;  %v325_v26 = vmul.f32 %v463_v18, %v735_v47  ;;  %v328_v27 = vadd.f32 %v324_v21, %v323_v19  ;;  %v469_v28 = vsel %vm369_vm3, 1.0, %v666_v1  ;;  %p637_p7 = por %p636_p6, %p635_p5 }
 0x179   :  { %v465_v29 = vsel %vm312_vm5, 1.0, %v666_v1  ;;  %vm371_vm7 = vcmp.eq.s32.totalorder %v761_v55, %v807_v7  ;;  %v382_v30 = vmul.f32 %v467_v14, %v731_v45  ;;  %v383_v31 = vmul.f32 %v468_v17, %v733_v46 }
 0x17a   :  { %v271_v32 = vadd.f32 %v270_v25, %v267_v22  ;;  %v326_v52 = vmul.f32 %v464_v24, %v737_v48  ;;  %v329_v33 = vadd.f32 %v328_v27, %v325_v26  ;;  %v470_v34 = vsel %vm370_vm6, 1.0, %v666_v1  ;;  %p638_p8 = pnand %p637_p7, %p631_p4 }
 0x17b   :  { %v384_v35 = vmul.f32 %v469_v28, %v735_v47  ;;  %v387_v36 = vadd.f32 %v383_v31, %v382_v30  ;;  %v327_v37 = vmul.f32 %v465_v29, %v739_v49  ;;  %v471_v39 = vsel %vm371_vm7, 1.0, %v666_v1 }
 0x17c   :  { %v272_v58 = vadd.f32 %v271_v32, %v268_v23  ;;  %v330_v38 = vadd.f32 %v329_v33, %v326_v52  ;;  %v385_v55 = vmul.f32 %v470_v34, %v737_v48  ;;  %v386_v41 = vmul.f32 %v471_v39, %v739_v49 }
 0x17d   :  { %v388_v45 = vadd.f32 %v387_v36, %v384_v35 }
 0x17e   :  { %v273_v40 = vrot.slane %v272_v58, 4  ;;  %v331_v46 = vadd.f32 %v330_v38, %v327_v37 }
 0x17f   :  { %v389_v42 = vadd.f32 %v388_v45, %v385_v55 }
 0x180   :  { %v274_v43 = vadd.f32 %v273_v40, %v272_v58  ;;  %v332_v50 = vrot.slane %v331_v46, 4 }
 0x181   :  { %v390_v51 = vadd.f32 %v389_v42, %v386_v41 }
 0x182   :  { %v275_v53 = vrot.slane %v274_v43, 2  ;;  %v333_v47 = vadd.f32 %v332_v50, %v331_v46 }
 0x183   :  { %v391_v56 = vrot.slane %v390_v51, 4 }
 0x184   :  { %v276_v57 = vadd.f32 %v275_v53, %v274_v43  ;;  %v334_v59 = vrot.slane %v333_v47, 2 }
 0x185   :  { %v392_v60 = vadd.f32 %v391_v56, %v390_v51 }
 0x186   :  { %v277_v61 = vrot.slane %v276_v57, 1  ;;  %v335_v62 = vadd.f32 %v334_v59, %v333_v47 }
 0x187   :  { %v393_v1 = vrot.slane %v392_v60, 2 }
 0x188   :  { %v278_v63 = vadd.f32 %v277_v61, %v276_v57  ;;  %v336_v48 = vrot.slane %v335_v62, 1 }
 0x189   :  { %v394_v0 = vadd.f32 %v393_v1, %v392_v60 }
 0x18a   :  { %280 = vst [vmem:[#allocation10] sm:$0x1] %v278_v63  ;;  %v337_v2 = vadd.f32 %v336_v48, %v335_v62 }
 0x18b   :  { %v395_v49 = vrot.slane %v394_v0, 1 }
 0x18c   :  { %339 = vst [vmem:[#allocation10 + $0x1] sm:$0x1] %v337_v2 }
 0x18d   :  { %v396_v3 = vadd.f32 %v395_v49, %v394_v0 }
 0x18f   :  { %398 = vst [vmem:[#allocation10 + $0x2] sm:$0x1] %v396_v3 }
 0x190   :  { %641 = shalt.err (!%p638_p8)
}
 0x191   :  { %s642_s13 = scalar_lea.hbm %s900_s4, 64 }
 0x192   :  { %p643_p9 = scmp.ne.s32.totalorder %s900_s4, %s642_s13  ;;  %p646_p10 = scmp.lt.u32.totalorder %s642_s13, %s900_s4 }
 0x194   :  { %p648_p11 = pnand %p646_p10, %p643_p9 }
 0x196   :  { %651 = shalt.err (!%p648_p11)
}
 0x197   :  { %430 = dma.vmem_to_hbm [thread:$0]  %s428_s10, 64, %s900_s4, [#allocation9]  }
 0x198   :  { %656 = dma.done.wait [#allocation4], 640  }
 0x199   :  { %657 = vsyncadd [#allocation4], 4294966656 }
 0x19a   :  { %658 = dma.done.wait [#allocation9], 128  }
 0x19b   :  { %659 = vsyncadd [#allocation9], 4294967168 }
 0x19c   :  { %440 = vsyncpa [#allocation3], 1 }
 0x19d   :  { %441 = vsyncpa [#allocation6], 1 }
 0x19e   :  { %442 = vsyncpa [#allocation4], 1 }
 0x19f   :  { %443 = vsyncpa [#allocation9], 1 }

</bundles_post_ra>
